<compile_context>
chip_gen: v7x
topology: tpu7x:2x2x1
jax: 0.10.0
libtpu: 0.0.40
codegen_flags: <defaults>
</compile_context>

<pallas_src>
import jax
import jax.numpy as jnp
from jax.experimental import pallas as pl
from jax.experimental.pallas import tpu as pltpu


def _seq_combiner_kernel(lens_ref, x_ref, w_attn_ref, w_proj_ref, b_proj_ref,
                         out_ref):
    """One grid step == one block of TB expressions.

    lens_ref  : VMEM (TB, 1) int32 — sequence lengths for this block
    x_ref     : VMEM (TB, S, E)    — token encodings for this block
    w_attn_ref: VMEM (1, 1, E)     — attention scoring vector
    w_proj_ref: VMEM (E, C)        — output projection
    b_proj_ref: VMEM (1, C)        — output bias
    out_ref   : VMEM (TB, C)       — combined expression encodings
    """
    x = x_ref[...]                                        # (TB, S, E) f32
    tb, s, _ = x.shape

    # Attention scores: VPU broadcast-multiply + lane (XLU) reduction; avoids
    # a degenerate N=1 MXU matvec.
    scores = jnp.sum(x * w_attn_ref[...], axis=-1)        # (TB, S)

    # Length mask over padded positions (pos >= length), vectorized over TB.
    pos = jax.lax.broadcasted_iota(jnp.int32, (tb, s), 1)  # (TB, S)
    valid = pos < lens_ref[...]                            # (TB, S)
    scores = jnp.where(valid, scores, jnp.float32(-1e30))

    # Numerically-stable softmax along the sequence axis.  The -1e30 sentinel
    # underflows exp(scores - m) to exactly 0 for masked positions, so no
    # re-masking is needed (assumes every expression has >= 1 token, as in the
    # source module).
    m = jnp.max(scores, axis=-1, keepdims=True)            # (TB, 1)
    ee = jnp.exp(scores - m)                               # (TB, S)
    denom = jnp.sum(ee, axis=-1, keepdims=True)            # (TB, 1)

    # Unnormalized attention-weighted pooling, then scale by the reciprocal of
    # the (TB,1) denominator instead of dividing a full-size tile.
    pooled = jnp.sum(ee[:, :, None] * x, axis=1)           # (TB, E)
    pooled = pooled * pl.reciprocal(denom, approx=False)   # (TB, E)

    # Output projection (MXU with a real M=TB dimension) + bias + ReLU.
    proj = jnp.dot(pooled, w_proj_ref[...],
                   preferred_element_type=jnp.float32) + b_proj_ref[...]
    out_ref[...] = jnp.maximum(proj, 0.0).astype(out_ref.dtype)   # (TB, C)


def code_expression_combiner(seq_encodings, seq_lengths, w_attn, w_proj,
                             b_proj, *, max_block_b=256,
                             vmem_budget_bytes=24 << 20):
    """Pallas wrapper.

    seq_encodings: (B, S, E) f32, seq_lengths: (B,) int, w_attn: (E, 1),
    w_proj: (E, C), b_proj: (1, C) or (C,).  Returns (B, C).
    """
    B, S, E = seq_encodings.shape
    C = w_proj.shape[1]

    # Pick the batch-tile size TB so the double-buffered input block fits a
    # conservative VMEM budget (re-derive per generation: 64 MiB VMEM on v7x).
    itemsize = jnp.dtype(seq_encodings.dtype).itemsize
    tb = vmem_budget_bytes // max(2 * S * E * itemsize, 1)
    tb = int(min(max_block_b, max(tb, 8)))
    if tb >= B:
        TB, Bp = B, B                       # single block == full batch dim
    else:
        TB = max((tb // 8) * 8, 8)          # tiling-friendly multiple of 8
        Bp = ((B + TB - 1) // TB) * TB      # pad batch up to a multiple of TB

    x = seq_encodings
    lens = seq_lengths.astype(jnp.int32)
    if Bp != B:
        x = jnp.pad(x, ((0, Bp - B), (0, 0), (0, 0)))
        lens = jnp.pad(lens, (0, Bp - B), constant_values=1)  # avoid 0-length

    lens2d = lens.reshape(Bp, 1)
    w_a = w_attn.reshape(1, 1, E)
    b_p = b_proj.reshape(1, C)

    grid_spec = pltpu.PrefetchScalarGridSpec(
        num_scalar_prefetch=0,
        grid=(Bp // TB,),
        in_specs=[
            pl.BlockSpec((TB, 1), lambda i: (i, 0)),        # lengths
            pl.BlockSpec((TB, S, E), lambda i: (i, 0, 0)),  # x
            pl.BlockSpec((1, 1, E), lambda i: (0, 0, 0)),   # w_attn
            pl.BlockSpec((E, C), lambda i: (0, 0)),         # w_proj
            pl.BlockSpec((1, C), lambda i: (0, 0)),         # b_proj
        ],
        out_specs=pl.BlockSpec((TB, C), lambda i: (i, 0)),
    )

    out = pl.pallas_call(
        _seq_combiner_kernel,
        out_shape=jax.ShapeDtypeStruct((Bp, C), seq_encodings.dtype),
        grid_spec=grid_spec,
        compiler_params=pltpu.CompilerParams(
            dimension_semantics=("parallel",)),
    )(lens2d, x, w_a, w_proj, b_p)

    return out[:B]


def _reference(seq_encodings, seq_lengths, w_attn, w_proj, b_proj):
    """Pure-JAX reference of the same forward pass."""
    B, S, E = seq_encodings.shape
    scores = jnp.einsum('bse,eh->bsh', seq_encodings, w_attn)      # (B,S,1)
    pos = jnp.arange(S)[None, :, None]
    valid = pos < seq_lengths[:, None, None]
    scores = jnp.where(valid, scores, -1e30)
    alpha = jax.nn.softmax(scores, axis=1)
    alpha = jnp.where(valid, alpha, 0.0)
    pooled = jnp.sum(alpha * seq_encodings, axis=1)                # (B,E)
    return jax.nn.relu(pooled @ w_proj + b_proj.reshape(1, -1))    # (B,C)


if __name__ == "__main__":
    # Small shapes implied by the forward pass:
    #   B expressions, each a token sequence of length <= S,
    #   token_encoding_dim = E, combined_expression_encoding_dim = C.
    B, S, E, C = 2, 8, 32, 32

    key = jax.random.PRNGKey(0)
    k_x, k_wa, k_wp, k_bp = jax.random.split(key, 4)

    seq_encodings = jax.random.normal(k_x, (B, S, E), dtype=jnp.float32)
    seq_lengths = jnp.array([5, 8], dtype=jnp.int32)

    # Deterministic synthetic parameter init (module __init__ shapes).
    w_attn = 0.1 * jax.random.normal(k_wa, (E, 1), dtype=jnp.float32)
    w_proj = 0.1 * jax.random.normal(k_wp, (E, C), dtype=jnp.float32)
    b_proj = 0.1 * jax.random.normal(k_bp, (1, C), dtype=jnp.float32)

    out = code_expression_combiner(seq_encodings, seq_lengths,
                                   w_attn, w_proj, b_proj)
    out = jax.block_until_ready(out)

    ref = _reference(seq_encodings, seq_lengths, w_attn, w_proj, b_proj)
    assert out.shape == (B, C)
    assert jnp.allclose(out, ref, atol=1e-5, rtol=1e-5), "mismatch vs reference"

    print("KERNEL_OK")
</pallas_src>

<mosaic_0001>
module attributes {stable_mosaic.version = 11 : i64} {
  func.func @_seq_combiner_kernel(%arg0: i32, %arg1: memref<2x1xi32, #tpu.memory_space<vmem>>, %arg2: memref<2x8x32xf32, #tpu.memory_space<vmem>>, %arg3: memref<1x1x32xf32, #tpu.memory_space<vmem>>, %arg4: memref<32x32xf32, #tpu.memory_space<vmem>>, %arg5: memref<1x32xf32, #tpu.memory_space<vmem>>, %arg6: memref<2x32xf32, #tpu.memory_space<vmem>>) attributes {dimension_semantics = [#tpu.dimension_semantics<parallel>], iteration_bounds = array<i64: 1>, scalar_prefetch = 0 : i64, scratch_operands = 0 : i64, tpu.core_type = #tpu.core_type<tc>, window_params = [{transform_indices = @transform_0, window_bounds = array<i64: 2, 1>}, {transform_indices = @transform_1, window_bounds = array<i64: 2, 8, 32>}, {pipeline_mode = #tpu.pipeline_mode<synchronous>, transform_indices = @transform_2, window_bounds = array<i64: 1, 1, 32>}, {pipeline_mode = #tpu.pipeline_mode<synchronous>, transform_indices = @transform_3, window_bounds = array<i64: 32, 32>}, {pipeline_mode = #tpu.pipeline_mode<synchronous>, transform_indices = @transform_4, window_bounds = array<i64: 1, 32>}, {transform_indices = @transform_5, window_bounds = array<i64: 2, 32>}]} {
    %c0 = arith.constant 0 : index
    %c0_0 = arith.constant 0 : index
    %c0_1 = arith.constant 0 : index
    %0 = vector.load %arg2[%c0, %c0_0, %c0_1] : memref<2x8x32xf32, #tpu.memory_space<vmem>>, vector<2x8x32xf32>
    %c0_2 = arith.constant 0 : index
    %c0_3 = arith.constant 0 : index
    %c0_4 = arith.constant 0 : index
    %1 = vector.load %arg3[%c0_2, %c0_3, %c0_4] : memref<1x1x32xf32, #tpu.memory_space<vmem>>, vector<1x1x32xf32>
    %2 = vector.broadcast %1 : vector<1x1x32xf32> to vector<2x8x32xf32>
    %3 = arith.mulf %0, %2 : vector<2x8x32xf32>
    %cst = arith.constant dense<0.000000e+00> : vector<2x8xf32>
    %4 = vector.multi_reduction <add>, %3, %cst [2] : vector<2x8x32xf32> to vector<2x8xf32>
    %5 = tpu.iota {dimensions = array<i32: 1>} : vector<2x8xi32>
    %c0_5 = arith.constant 0 : index
    %c0_6 = arith.constant 0 : index
    %6 = vector.load %arg1[%c0_5, %c0_6] : memref<2x1xi32, #tpu.memory_space<vmem>>, vector<2x1xi32>
    %7 = vector.broadcast %6 : vector<2x1xi32> to vector<2x8xi32>
    %8 = arith.cmpi slt, %5, %7 : vector<2x8xi32>
    %cst_7 = arith.constant -1.000000e+30 : f32
    %9 = vector.broadcast %cst_7 : f32 to vector<2x8xf32>
    %10 = arith.select %8, %4, %9 : vector<2x8xi1>, vector<2x8xf32>
    %cst_8 = arith.constant dense<0xFF800000> : vector<2xf32>
    %11 = vector.multi_reduction <maximumf>, %10, %cst_8 [1] : vector<2x8xf32> to vector<2xf32>
    %12 = vector.shape_cast %11 : vector<2xf32> to vector<2x1xf32>
    %13 = vector.broadcast %12 : vector<2x1xf32> to vector<2x8xf32>
    %14 = arith.subf %10, %13 : vector<2x8xf32>
    %15 = math.exp %14 : vector<2x8xf32>
    %cst_9 = arith.constant dense<0.000000e+00> : vector<2xf32>
    %16 = vector.multi_reduction <add>, %15, %cst_9 [1] : vector<2x8xf32> to vector<2xf32>
    %17 = vector.shape_cast %16 : vector<2xf32> to vector<2x1xf32>
    %18 = vector.shape_cast %15 : vector<2x8xf32> to vector<2x8x1xf32>
    %19 = vector.broadcast %18 : vector<2x8x1xf32> to vector<2x8x32xf32>
    %20 = arith.mulf %19, %0 : vector<2x8x32xf32>
    %cst_10 = arith.constant dense<0.000000e+00> : vector<2x32xf32>
    %21 = vector.multi_reduction <add>, %20, %cst_10 [1] : vector<2x8x32xf32> to vector<2x32xf32>
    %22 = tpu.reciprocal %17 : vector<2x1xf32> -> vector<2x1xf32>
    %23 = vector.broadcast %22 : vector<2x1xf32> to vector<2x32xf32>
    %24 = arith.mulf %21, %23 : vector<2x32xf32>
    %c0_11 = arith.constant 0 : index
    %c0_12 = arith.constant 0 : index
    %25 = vector.load %arg4[%c0_11, %c0_12] : memref<32x32xf32, #tpu.memory_space<vmem>>, vector<32x32xf32>
    %cst_13 = arith.constant dense<0.000000e+00> : vector<2x32xf32>
    %26 = tpu.matmul %24, %25, %cst_13 {dimension_numbers = #tpu.dot_dimension_numbers<[1], [0], [0], [1], [0, 0, 1, 1], [], []>} : vector<2x32xf32>, vector<32x32xf32>, vector<2x32xf32> -> vector<2x32xf32>
    %c0_14 = arith.constant 0 : index
    %c0_15 = arith.constant 0 : index
    %27 = vector.load %arg5[%c0_14, %c0_15] : memref<1x32xf32, #tpu.memory_space<vmem>>, vector<1x32xf32>
    %28 = vector.broadcast %27 : vector<1x32xf32> to vector<2x32xf32>
    %29 = arith.addf %26, %28 : vector<2x32xf32>
    %cst_16 = arith.constant 0.000000e+00 : f32
    %30 = vector.broadcast %cst_16 : f32 to vector<2x32xf32>
    %31 = arith.maximumf %29, %30 : vector<2x32xf32>
    %c0_17 = arith.constant 0 : index
    %c0_18 = arith.constant 0 : index
    %32 = vector.load %arg6[%c0_17, %c0_18] : memref<2x32xf32, #tpu.memory_space<vmem>>, vector<2x32xf32>
    tpu.vector_store %arg6[%c0_17, %c0_18], %31 {strides = array<i32>} : memref<2x32xf32, #tpu.memory_space<vmem>>, vector<2x32xf32>,
    return
  }
  func.func @transform_0(%arg0: i32) -> (i32, i32) {
    %c0_i32 = arith.constant 0 : i32
    %c0_i32_0 = arith.constant 0 : i32
    return %arg0, %c0_i32 : i32, i32
  }
  func.func @transform_1(%arg0: i32) -> (i32, i32, i32) {
    %c0_i32 = arith.constant 0 : i32
    %c0_i32_0 = arith.constant 0 : i32
    %c0_i32_1 = arith.constant 0 : i32
    return %arg0, %c0_i32, %c0_i32_0 : i32, i32, i32
  }
  func.func @transform_2(%arg0: i32) -> (i32, i32, i32) {
    %c0_i32 = arith.constant 0 : i32
    %c0_i32_0 = arith.constant 0 : i32
    %c0_i32_1 = arith.constant 0 : i32
    %c0_i32_2 = arith.constant 0 : i32
    return %c0_i32, %c0_i32_0, %c0_i32_1 : i32, i32, i32
  }
  func.func @transform_3(%arg0: i32) -> (i32, i32) {
    %c0_i32 = arith.constant 0 : i32
    %c0_i32_0 = arith.constant 0 : i32
    %c0_i32_1 = arith.constant 0 : i32
    return %c0_i32, %c0_i32_0 : i32, i32
  }
  func.func @transform_4(%arg0: i32) -> (i32, i32) {
    %c0_i32 = arith.constant 0 : i32
    %c0_i32_0 = arith.constant 0 : i32
    %c0_i32_1 = arith.constant 0 : i32
    return %c0_i32, %c0_i32_0 : i32, i32
  }
  func.func @transform_5(%arg0: i32) -> (i32, i32) {
    %c0_i32 = arith.constant 0 : i32
    %c0_i32_0 = arith.constant 0 : i32
    return %arg0, %c0_i32 : i32, i32
  }
}

</mosaic_0001>

<bundles_post_ra>
// kernel: tpu_custom_call.1
= control target key start
LH: loop header
LB: loop body
LE: loop exit
PB: predicated region body
PF: predicated region fallthrough
CT: control target
= control target key end

     0   :  { %10 = vsyncpa [#allocation3], 0  ;;  %s444_s0 = inlined_call_operand.vmem [shape: s32[2,1], index: 0, kind: input, shape index: {}]   ;;  %s445_s1 = inlined_call_operand.hbm [shape: f32[2,8,32], index: 1, kind: input, shape index: {}]   ;;  %s446_s2 = inlined_call_operand.vmem [shape: f32[1,1,32], index: 2, kind: input, shape index: {}]   ;;  %s447_s3 = inlined_call_operand.hbm [shape: f32[32,32], index: 3, kind: input, shape index: {}]   ;;  %s448_s4 = inlined_call_operand.vmem [shape: f32[1,32], index: 4, kind: input, shape index: {}]   ;;  %s449_s5 = inlined_call_operand.hbm [shape: f32[2,32], index: 5, kind: output, shape index: {}]  }
   0x1   :  { %11 = vsyncpa [#allocation6], 0 }
   0x2   :  { %12 = vsyncpa [#allocation4], 0  ;;  %s353_s18 = smov [#allocation2]   ;;  %s281_s22 = scalar_lea.hbm %s445_s1, 256 }
   0x3   :  { %s20_s19 = sshll.u32 %s353_s18, 4  ;;  %p282_p0 = scmp.ne.s32.totalorder %s445_s1, %s281_s22  ;;  %s21_s19 = int_to_ptr.vmem [resolvable:$true] %s20_s19 }
   0x4   :  { %p285_p1 = scmp.lt.u32.totalorder %s281_s22, %s445_s1 }
   0x6   :  { %p287_p2 = pnand %p285_p1, %p282_p0 }
   0x8   :  { %290 = shalt.err (!%p287_p2)
}
   0x9   :  { %s291_s27 = scalar_lea.vmem %s21_s19, 256  ;;  %p296_p4 = scmp.lt.s32.totalorder %s21_s19, %s21_s19 }
   0xa   :  { %p292_p3 = scmp.ne.s32.totalorder %s21_s19, %s291_s27  ;;  %p297_p5 = scmp.lt.s32.totalorder %s291_s27, %s291_s27 }
   0xc   :  { %p298_p6 = por %p297_p5, %p296_p4 }
   0xe   :  { %p299_p7 = pnand %p298_p6, %p292_p3 }
  0x10   :  { %302 = shalt.err (!%p299_p7)
}
  0x11   :  { %s354_s28 = smov 128   ;;  %s355_s29 = smov 8  }
  0x12   :  { %26 = dma.hbm_to_vmem [thread:$0]  %s445_s1, 256, %s21_s19, [#allocation3], %s354_s28, %s354_s28, %s355_s29  }
  0x13   :  { %s356_s7 = smov [#allocation5]   ;;  %s303_s11 = scalar_lea.hbm %s447_s3, 512 }
  0x14   :  { %s34_s8 = sshll.u32 %s356_s7, 4  ;;  %p304_p8 = scmp.ne.s32.totalorder %s447_s3, %s303_s11  ;;  %s35_s8 = int_to_ptr.vmem [resolvable:$true] %s34_s8 }
  0x15   :  { %p307_p9 = scmp.lt.u32.totalorder %s303_s11, %s447_s3 }
  0x17   :  { %p309_p10 = pnand %p307_p9, %p304_p8 }
  0x19   :  { %312 = shalt.err (!%p309_p10)
}
  0x1a   :  { %s313_s16 = scalar_lea.vmem %s35_s8, 512  ;;  %p318_p12 = scmp.lt.s32.totalorder %s35_s8, %s35_s8 }
  0x1b   :  { %p314_p11 = scmp.ne.s32.totalorder %s35_s8, %s313_s16  ;;  %p319_p13 = scmp.lt.s32.totalorder %s313_s16, %s313_s16 }
  0x1d   :  { %p320_p0 = por %p319_p13, %p318_p12 }
  0x1f   :  { %p321_p1 = pnand %p320_p0, %p314_p11 }
  0x21   :  { %324 = shalt.err (!%p321_p1)
}
  0x22   :  { %40 = dma.hbm_to_vmem [thread:$0]  %s447_s3, 512, %s35_s8, [#allocation6], %s354_s28, %s354_s28, %s355_s29  }
  0x23   :  { %347 = dma.done.wait [#allocation3], 256  }
  0x24   :  { %348 = vsyncadd [#allocation3], 4294967040 }
  0x25   :  { %349 = dma.done.wait [#allocation6], 512  }
  0x26   :  { %350 = vsyncadd [#allocation6], 4294966784  ;;  %v357_v0 = vmov 0   ;;  %v49_v1 = vld [vmem:[#allocation2] sm:$0xff]  ;;  %vm60_vm0 = vcmask 261120   ;;  %v50_v3 = vld [vmem:[#allocation2 + $0x8] sm:$0xff]  ;;  %v67_v9 = vlaneseq }
  0x27   :  { %275 = vset.pattern.permute.xlu1 %v357_v0  ;;  %276 = vset.pattern.permute.xlu0 %v357_v0  ;;  %v241_v2 = vld [vmem:[%s446_s2] ss:$0 sm:$0xff]  ;;  %vm84_vm1 = vcmask 1041409   ;;  %vm88_vm3 = vcmask 58368   ;;  %v135_v30 = vld [vmem:[#allocation5] sm:$0xff]  ;;  %v136_v31 = vld [vmem:[#allocation5 + $0x8] sm:$0xff] }
  0x28   :  { %v58_v4 = vmul.f32 %v241_v2, %v49_v1  ;;  %v59_v5 = vmul.f32 %v241_v2, %v50_v3  ;;  %v69_v6 = vld [vmem:[%s444_s0] sm:$0x3]  ;;  %v68_v10 = vand.u32 127, %v67_v9  ;;  %v77_v11 = vshrl.u32 %v67_v9, 7  ;;  %v138_v35 = vld [vmem:[#allocation5 + $0x18] sm:$0xff]  ;;  %s361_s3 = smov [#allocation7]  }
  0x29   :  { %71 = vperm.xlu1 %275, %v69_v6   ;;  %v261_v32 = vpack.c.bf16 %v136_v31, %v135_v30  ;;  %v358_v33 = vmov 0.0|0.0   ;;  %v137_v34 = vld [vmem:[#allocation5 + $0x10] sm:$0xff]  ;;  %vm359_vm4 = vmmov 0   ;;  %v360_v37 = vmov 0.0   ;;  %s231_s22 = sshll.u32 %s361_s3, 4  ;;  %s232_s22 = int_to_ptr.vmem [resolvable:$true] %s231_s22 }
  0x2a   :  { %v61_v7 = vsel %vm60_vm0, %v58_v4, 0.0  ;;  %v64_v8 = vsel %vm60_vm0, %v59_v5, 0.0  ;;  %v78_v13 = vsub.s32 %v68_v10, %v77_v11  ;;  %v107_v26 = vsub.s32 1, %v77_v11  ;;  %260 = vmatprep.subr.bf16.mxu0 %v358_v33  ;;  %257 = vmatprep.mubr.msk.f32.mxu0 %vm359_vm4, %v360_v37  ;;  %v242_v63 = vld [vmem:[%s448_s4] ss:$0 sm:$0xff]  ;;  %s325_s23 = scalar_lea.vmem %s232_s22, 32  ;;  %p330_p3 = scmp.lt.s32.totalorder %s232_s22, %s232_s22 }
  0x2b   :  { %62 = vadd.xlane.f32.xlu0 %v61_v7  ;;  %v100_v28 = vsub.s32 0, %v77_v11  ;;  %262 = vmatpush3.bf16.msra.mxu0 %v261_v32  ;;  %v264_v36 = vpack.c.bf16 %v138_v35, %v137_v34  ;;  %vm223_vm5 = vcmask 254976   ;;  %p326_p2 = scmp.ne.s32.totalorder %s232_s22, %s325_s23  ;;  %p331_p4 = scmp.lt.s32.totalorder %s325_s23, %s325_s23 }
  0x2c   :  { %263 = vmatprep.subr.bf16.mxu0 %v358_v33 }
  0x2d   :  { %p332_p5 = por %p331_p4, %p330_p3 }
  0x2f   :  { %65 = vadd.xlane.f32.xlu0 %v64_v8  ;;  %265 = vmatpush3.bf16.msra.mxu0 %v264_v36  ;;  %p333_p6 = pnand %p332_p5, %p326_p2 }
  0xa8   :  { %v72_v14 = vpop.permute.xlu1 %71 }
  0xa9   :  { %vm73_vm2 = vcmp.lt.s32.totalorder %v68_v10, %v72_v14 }
  0xb8   :  { %v63_v12 = vpop.xlane.xlu0 %62 }
  0xb9   :  { %v79_v16 = vrot.slane %v63_v12, %v78_v13 }
  0xbc   :  { %v66_v15 = vpop.xlane.xlu0 %65 }
  0xbd   :  { %v83_v17 = vrot.slane %v66_v15, %v78_v13 }
  0xbf   :  { %v85_v18 = vsel %vm84_vm1, %v83_v17, %v79_v16 }
  0xc0   :  { %v87_v19 = vsel %vm73_vm2, %v85_v18, -1e+30 }
  0xc1   :  { %v89_v20 = vsel %vm88_vm3, %v87_v19, -inf }
  0xc2   :  { %90 = vmax.xlane.f32.xlu1 %v89_v20 }
 0x14f   :  { %v91_v21 = vpop.xlane.xlu1 %90 }
 0x150   :  { %v92_v22 = vsub.f32 %v87_v19, %v91_v21 }
 0x152   :  { %v93_v23 = vmul.f32 1.442695, %v92_v22 }
 0x154   :  { %277 = vpow2.f32 %v93_v23 }
 0x15e   :  { %v278_v24 = vpop.eup %277 }
 0x15f   :  { %v95_v25 = vsel %vm88_vm3, %v278_v24, 0.0  ;;  %v108_v27 = vrot.slane %v278_v24, %v107_v26  ;;  %v101_v29 = vrot.slane %v278_v24, %v100_v28 }
 0x160   :  { %96 = vadd.xlane.f32.xlu0 %v95_v25 }
 0x176   :  { %110 = vbcast.lane.b32.xlu0 %v108_v27, 256 }
 0x17a   :  { %103 = vbcast.lane.b32.xlu0 %v101_v29, 256 }
 0x1ed   :  { %v97_v38 = vpop.xlane.xlu0 %96 }
 0x1ee   :  { %279 = vrcp.f32 %v97_v38 }
 0x1f1   :  { %v111_v39 = vpop.permute.xlu0 %110 }
 0x1f2   :  { %v113_v40 = vmul.f32 %v111_v39, %v50_v3 }
 0x1f4   :  { %v121_v41 = vsel %vm60_vm0, %v113_v40, 0.0 }
 0x1f5   :  { %v122_v42 = vrot.slane %v121_v41, 4  ;;  %v104_v43 = vpop.permute.xlu0 %103 }
 0x1f6   :  { %v112_v44 = vmul.f32 %v104_v43, %v49_v1 }
 0x1f7   :  { %v123_v45 = vadd.f32 %v122_v42, %v121_v41 }
 0x1f8   :  { %v114_v46 = vsel %vm60_vm0, %v112_v44, 0.0  ;;  %v280_v51 = vpop.eup %279 }
 0x1f9   :  { %v124_v47 = vrot.slane %v123_v45, 2  ;;  %v115_v48 = vrot.slane %v114_v46, 4  ;;  %v130_v56 = vrot.slane %v280_v51, 1 }
 0x1fb   :  { %v125_v49 = vadd.f32 %v124_v47, %v123_v45  ;;  %v116_v50 = vadd.f32 %v115_v48, %v114_v46 }
 0x1fd   :  { %v126_v52 = vrot.slane %v125_v49, 1  ;;  %v117_v53 = vrot.slane %v116_v50, 2 }
 0x1ff   :  { %v127_v54 = vadd.f32 %v126_v52, %v125_v49  ;;  %v118_v55 = vadd.f32 %v117_v53, %v116_v50 }
 0x201   :  { %v119_v57 = vrot.slane %v118_v55, 1  ;;  %v134_v58 = vmul.f32 %v130_v56, %v127_v54 }
 0x203   :  { %v120_v59 = vadd.f32 %v119_v57, %v118_v55  ;;  %v148_v61 = vrot.slane %v134_v58, 7 }
 0x205   :  { %v133_v60 = vmul.f32 %v280_v51, %v120_v59 }
 0x207   :  { %v149_v62 = vsel %vm84_vm1, %v148_v61, %v133_v60 }
 0x208   :  { %258 = vmatmul.mubr.msk.f32.vlgmr.msra.gmra.mrb[0].mxu0 %vm60_vm0, %v149_v62 }
 0x2db   :  { %v218_v0 = vpop.f32.mrb[0].mxu0 }
 0x2dc   :  { %v219_v1 = vadd.f32 %v242_v63, %v218_v0  ;;  %v259_v2 = vpop.f32.mrb[1].mxu0 }
 0x2de   :  { %v222_v3 = vmax.f32 %v219_v1, 0.0 }
 0x2e0   :  { %224 = vst.msk [vmem:[#allocation7] sm:$0x3] %vm223_vm5, %v222_v3 }
 0x2e1   :  { %336 = shalt.err (!%p333_p6)
}
 0x2e2   :  { %s337_s4 = scalar_lea.hbm %s449_s5, 32 }
 0x2e3   :  { %p338_p7 = scmp.ne.s32.totalorder %s449_s5, %s337_s4  ;;  %p341_p8 = scmp.lt.u32.totalorder %s337_s4, %s449_s5 }
 0x2e5   :  { %p343_p9 = pnand %p341_p8, %p338_p7 }
 0x2e7   :  { %346 = shalt.err (!%p343_p9)
}
 0x2e8   :  { %234 = dma.vmem_to_hbm [thread:$0]  %s232_s22, 32, %s449_s5, [#allocation4]  }
 0x2e9   :  { %351 = dma.done.wait [#allocation4], 32  }
 0x2ea   :  { %352 = vsyncadd [#allocation4], 4294967264 }
 0x2eb   :  { %238 = vsyncpa [#allocation3], 1 }
 0x2ec   :  { %239 = vsyncpa [#allocation6], 1 }
 0x2ed   :  { %240 = vsyncpa [#allocation4], 1 }

</bundles_post_ra>
